<compile_context>
chip_gen: v7x
topology: tpu7x:2x2x1
jax: 0.10.0
libtpu: 0.0.40
codegen_flags: <defaults>
</compile_context>

<pallas_src>
import jax
import jax.numpy as jnp
import numpy as np
from jax.experimental import pallas as pl
from jax.experimental.pallas import tpu as pltpu


def _cdiv(a, b):
    return -(-a // b)


# ----------------------------- Pallas kernel --------------------------------
def _sepconv_kernel(xp_ref, w_ref, out_ref, acc_ref):
    """One group of stacked padded images -> one lane-dense output slab.

    xp_ref : (M + k - 1, Wp*C)   bf16, NB padded images stacked along rows,
                                 plus k-1 trailing zero halo rows
    w_ref  : (k, Wp*C, Wo*CO)    bf16, per-dy banded fused dw*pw weights
    out_ref: (M, Wo*CO)          f32, lane-dense output slab
    acc_ref: (M, Wo*CO)          f32 VMEM accumulator scratch
    """
    k = w_ref.shape[0]
    m = out_ref.shape[0]

    x = xp_ref[...]                             # load the padded tile once
    acc_ref[...] = jnp.dot(x[0:m, :], w_ref[0],
                           preferred_element_type=jnp.float32)
    for dy in range(1, k):                      # static unroll: k MXU pushes
        acc_ref[...] += jnp.dot(x[dy:dy + m, :], w_ref[dy],
                                preferred_element_type=jnp.float32)
    out_ref[...] = acc_ref[...].astype(out_ref.dtype)


# ------------------------------- wrapper -------------------------------------
def separable_conv2d_forward(x_nchw, w_dw, w_pw, *, images_per_block=None):
    """x_nchw: (N, C, H, W); w_dw: (C, 1, k, k); w_pw: (CO, C, 1, 1)."""
    N, C, H, W = x_nchw.shape
    CO = w_pw.shape[0]
    k = w_dw.shape[-1]
    pad = 1                                     # the module hard-codes padding=1
    Hp, Wp = H + 2 * pad, W + 2 * pad
    Ho, Wo = Hp - k + 1, Wp - k + 1

    # Row-packing heuristic: feed the MXU M dim (~128 rows) but keep >= 2 grid
    # steps when the batch allows (so v7x megacore has parallel work and the
    # software pipeline reaches a steady state).
    if images_per_block is None:
        nb = max(1, _cdiv(128, Hp))
        if N >= 2:
            nb = min(nb, _cdiv(N, 2))
        images_per_block = max(1, min(N, nb))
    nb = images_per_block
    G = _cdiv(N, nb)                            # grid steps (parallel)
    Np = G * nb                                 # batch padded to whole groups
    M = nb * Hp                                 # matmul M rows per grid step

    # Activations: NCHW -> channels-last, zero pad, lane-pack (W, C), stack nb
    # images along the row axis, append k-1 zero halo rows, cast to bf16.
    x_nhwc = jnp.transpose(x_nchw, (0, 2, 3, 1))
    xp = jnp.pad(x_nhwc, ((0, Np - N), (pad, pad), (pad, pad), (0, 0)))
    xp = xp.reshape(G, M, Wp * C)
    xp = jnp.pad(xp, ((0, 0), (0, k - 1), (0, 0))).astype(jnp.bfloat16)

    # Fused per-dy banded weight:
    #   W_dy[wi*C + c, wo*CO + o] = w_dw[c, dy, wi - wo] * w_pw[o, c]
    #                               for 0 <= wi - wo < k, else 0
    # so one matmul per dy over the full padded row replaces the k*k tap loop.
    taps = jnp.einsum('ckl,oc->klco',
                      w_dw[:, 0].astype(jnp.float32),
                      w_pw[:, :, 0, 0].astype(jnp.float32))            # (k,k,C,CO)
    sel = (jnp.arange(Wp)[None, :, None]
           == jnp.arange(Wo)[None, None, :] + jnp.arange(k)[:, None, None]
           ).astype(jnp.float32)                                        # (k,Wp,Wo)
    w_band = jnp.einsum('xiw,yxco->yicwo', sel, taps)                   # (k,Wp,C,Wo,CO)
    w_band = w_band.reshape(k, Wp * C, Wo * CO).astype(jnp.bfloat16)

    # VMEM budget check (sized for v7x: 64 MiB physical / 32 MiB scoped default).
    vmem_bytes = (2 * (M + k - 1) * Wp * C * 2      # double-buffered bf16 input
                  + 1 * k * Wp * C * Wo * CO * 2    # single-buffered bf16 weight
                  + 2 * M * Wo * CO * 4             # double-buffered f32 output
                  + M * Wo * CO * 4)                # f32 accumulator scratch
    if vmem_bytes > 30 * 1024 * 1024:
        # TODO(synk): row-tile tall images (1-row halo) instead of failing.
        raise NotImplementedError(
            f"tile needs ~{vmem_bytes / 2**20:.1f} MiB VMEM; add row tiling")

    out_flat = pl.pallas_call(
        _sepconv_kernel,
        out_shape=jax.ShapeDtypeStruct((G, M, Wo * CO), jnp.float32),
        grid_spec=pltpu.PrefetchScalarGridSpec(
            num_scalar_prefetch=0,
            grid=(G,),
            in_specs=[
                pl.BlockSpec((None, M + k - 1, Wp * C), lambda g: (g, 0, 0)),
                # constant across the grid -> single-buffered
                pl.BlockSpec((k, Wp * C, Wo * CO), lambda g: (0, 0, 0),
                             pipeline_mode=pl.Buffered(buffer_count=1)),
            ],
            out_specs=pl.BlockSpec((None, M, Wo * CO), lambda g: (g, 0, 0)),
            scratch_shapes=[pltpu.VMEM((M, Wo * CO), jnp.float32)],
        ),
        compiler_params=pltpu.CompilerParams(
            dimension_semantics=("parallel",)),
    )(xp, w_band)

    # Drop the k-1 junk rows per image and the batch padding; back to NCHW.
    out = out_flat.reshape(Np, Hp, Wo * CO)[:N, :Ho]
    return out.reshape(N, Ho, Wo, CO).transpose(0, 3, 1, 2)


# --------------------------- pure-JAX reference ------------------------------
def ref_forward(x, w_dw, w_pw):
    dw = jax.lax.conv_general_dilated(
        x, w_dw, window_strides=(1, 1), padding=((1, 1), (1, 1)),
        dimension_numbers=('NCHW', 'OIHW', 'NCHW'),
        feature_group_count=x.shape[1])
    return jax.lax.conv_general_dilated(
        dw, w_pw, window_strides=(1, 1), padding='VALID',
        dimension_numbers=('NCHW', 'OIHW', 'NCHW'))


if __name__ == "__main__":
    N, C, CO, H, W, K = 4, 4, 8, 16, 16, 3       # out: (4, 8, 16, 16)
    key = jax.random.PRNGKey(0)
    kx, kd, kp = jax.random.split(key, 3)
    x = jax.random.normal(kx, (N, C, H, W), jnp.float32)
    w_dw = 0.3 * jax.random.normal(kd, (C, 1, K, K), jnp.float32)    # depthwise
    w_pw = 0.3 * jax.random.normal(kp, (CO, C, 1, 1), jnp.float32)   # pointwise

    out = separable_conv2d_forward(x, w_dw, w_pw)
    out = jax.block_until_ready(out)

    expected = ref_forward(x, w_dw, w_pw)
    # bf16 inputs/weights on the MXU (f32 accumulate) -> loosened tolerance.
    np.testing.assert_allclose(np.asarray(out), np.asarray(expected),
                               rtol=2e-2, atol=2e-2)
    assert out.shape == (N, CO, H, W)
    print("KERNEL_OK")
</pallas_src>

<mosaic_0001>
module attributes {stable_mosaic.version = 11 : i64} {
  func.func @_sepconv_kernel(%arg0: i32, %arg1: memref<1x38x72xbf16, #tpu.memory_space<vmem>>, %arg2: memref<3x72x128xbf16, #tpu.memory_space<vmem>>, %arg3: memref<1x36x128xf32, #tpu.memory_space<vmem>>, %arg4: memref<36x128xf32, #tpu.memory_space<vmem>>) attributes {dimension_semantics = [#tpu.dimension_semantics<parallel>], iteration_bounds = array<i64: 2>, scalar_prefetch = 0 : i64, scratch_operands = 1 : i64, tpu.core_type = #tpu.core_type<tc>, window_params = [{transform_indices = @transform_0, window_bounds = array<i64: 1, 38, 72>}, {pipeline_mode = #tpu.pipeline_mode<synchronous>, transform_indices = @transform_1, window_bounds = array<i64: 3, 72, 128>}, {transform_indices = @transform_2, window_bounds = array<i64: 1, 36, 128>}]} {
    %c0 = arith.constant 0 : index
    %c0_0 = arith.constant 0 : index
    %c0_1 = arith.constant 0 : index
    %0 = vector.load %arg1[%c0, %c0_0, %c0_1] : memref<1x38x72xbf16, #tpu.memory_space<vmem>>, vector<1x38x72xbf16>
    %1 = vector.shape_cast %0 : vector<1x38x72xbf16> to vector<38x72xbf16>
    %2 = vector.extract_strided_slice %1 {offsets = [0, 0], sizes = [36, 72], strides = [1, 1]} : vector<38x72xbf16> to vector<36x72xbf16>
    %c0_2 = arith.constant 0 : index
    %c0_3 = arith.constant 0 : index
    %c0_4 = arith.constant 0 : index
    %3 = vector.load %arg2[%c0_2, %c0_3, %c0_4] : memref<3x72x128xbf16, #tpu.memory_space<vmem>>, vector<1x72x128xbf16>
    %4 = vector.shape_cast %3 : vector<1x72x128xbf16> to vector<72x128xbf16>
    %cst = arith.constant dense<0.000000e+00> : vector<36x128xf32>
    %5 = tpu.matmul %2, %4, %cst {dimension_numbers = #tpu.dot_dimension_numbers<[1], [0], [0], [1], [0, 0, 1, 1], [], []>} : vector<36x72xbf16>, vector<72x128xbf16>, vector<36x128xf32> -> vector<36x128xf32>
    %c0_5 = arith.constant 0 : index
    %c0_6 = arith.constant 0 : index
    %6 = vector.load %arg4[%c0_5, %c0_6] : memref<36x128xf32, #tpu.memory_space<vmem>>, vector<36x128xf32>
    tpu.vector_store %arg4[%c0_5, %c0_6], %5 {strides = array<i32>} : memref<36x128xf32, #tpu.memory_space<vmem>>, vector<36x128xf32>,
    %c0_7 = arith.constant 0 : index
    %c0_8 = arith.constant 0 : index
    %7 = vector.load %arg4[%c0_7, %c0_8] : memref<36x128xf32, #tpu.memory_space<vmem>>, vector<36x128xf32>
    %8 = vector.extract_strided_slice %1 {offsets = [1, 0], sizes = [36, 72], strides = [1, 1]} : vector<38x72xbf16> to vector<36x72xbf16>
    %c1 = arith.constant 1 : index
    %c0_9 = arith.constant 0 : index
    %c0_10 = arith.constant 0 : index
    %9 = vector.load %arg2[%c1, %c0_9, %c0_10] : memref<3x72x128xbf16, #tpu.memory_space<vmem>>, vector<1x72x128xbf16>
    %10 = vector.shape_cast %9 : vector<1x72x128xbf16> to vector<72x128xbf16>
    %cst_11 = arith.constant dense<0.000000e+00> : vector<36x128xf32>
    %11 = tpu.matmul %8, %10, %cst_11 {dimension_numbers = #tpu.dot_dimension_numbers<[1], [0], [0], [1], [0, 0, 1, 1], [], []>} : vector<36x72xbf16>, vector<72x128xbf16>, vector<36x128xf32> -> vector<36x128xf32>
    %12 = arith.addf %7, %11 : vector<36x128xf32>
    %c0_12 = arith.constant 0 : index
    %c0_13 = arith.constant 0 : index
    %13 = vector.load %arg4[%c0_12, %c0_13] : memref<36x128xf32, #tpu.memory_space<vmem>>, vector<36x128xf32>
    tpu.vector_store %arg4[%c0_12, %c0_13], %12 {strides = array<i32>} : memref<36x128xf32, #tpu.memory_space<vmem>>, vector<36x128xf32>,
    %c0_14 = arith.constant 0 : index
    %c0_15 = arith.constant 0 : index
    %14 = vector.load %arg4[%c0_14, %c0_15] : memref<36x128xf32, #tpu.memory_space<vmem>>, vector<36x128xf32>
    %15 = vector.extract_strided_slice %1 {offsets = [2, 0], sizes = [36, 72], strides = [1, 1]} : vector<38x72xbf16> to vector<36x72xbf16>
    %c2 = arith.constant 2 : index
    %c0_16 = arith.constant 0 : index
    %c0_17 = arith.constant 0 : index
    %16 = vector.load %arg2[%c2, %c0_16, %c0_17] : memref<3x72x128xbf16, #tpu.memory_space<vmem>>, vector<1x72x128xbf16>
    %17 = vector.shape_cast %16 : vector<1x72x128xbf16> to vector<72x128xbf16>
    %cst_18 = arith.constant dense<0.000000e+00> : vector<36x128xf32>
    %18 = tpu.matmul %15, %17, %cst_18 {dimension_numbers = #tpu.dot_dimension_numbers<[1], [0], [0], [1], [0, 0, 1, 1], [], []>} : vector<36x72xbf16>, vector<72x128xbf16>, vector<36x128xf32> -> vector<36x128xf32>
    %19 = arith.addf %14, %18 : vector<36x128xf32>
    %c0_19 = arith.constant 0 : index
    %c0_20 = arith.constant 0 : index
    %20 = vector.load %arg4[%c0_19, %c0_20] : memref<36x128xf32, #tpu.memory_space<vmem>>, vector<36x128xf32>
    tpu.vector_store %arg4[%c0_19, %c0_20], %19 {strides = array<i32>} : memref<36x128xf32, #tpu.memory_space<vmem>>, vector<36x128xf32>,
    %c0_21 = arith.constant 0 : index
    %c0_22 = arith.constant 0 : index
    %21 = vector.load %arg4[%c0_21, %c0_22] : memref<36x128xf32, #tpu.memory_space<vmem>>, vector<36x128xf32>
    %c0_23 = arith.constant 0 : index
    %c0_24 = arith.constant 0 : index
    %c0_25 = arith.constant 0 : index
    %22 = vector.load %arg3[%c0_23, %c0_24, %c0_25] : memref<1x36x128xf32, #tpu.memory_space<vmem>>, vector<1x36x128xf32>
    %23 = vector.shape_cast %22 : vector<1x36x128xf32> to vector<36x128xf32>
    %24 = vector.shape_cast %21 : vector<36x128xf32> to vector<1x36x128xf32>
    tpu.vector_store %arg3[%c0_23, %c0_24, %c0_25], %24 {strides = array<i32>} : memref<1x36x128xf32, #tpu.memory_space<vmem>>, vector<1x36x128xf32>,
    return
  }
  func.func @transform_0(%arg0: i32) -> (i32, i32, i32) {
    %c0_i32 = arith.constant 0 : i32
    %c0_i32_0 = arith.constant 0 : i32
    %c0_i32_1 = arith.constant 0 : i32
    return %arg0, %c0_i32, %c0_i32_0 : i32, i32, i32
  }
  func.func @transform_1(%arg0: i32) -> (i32, i32, i32) {
    %c0_i32 = arith.constant 0 : i32
    %c0_i32_0 = arith.constant 0 : i32
    %c0_i32_1 = arith.constant 0 : i32
    %c0_i32_2 = arith.constant 0 : i32
    return %c0_i32, %c0_i32_0, %c0_i32_1 : i32, i32, i32
  }
  func.func @transform_2(%arg0: i32) -> (i32, i32, i32) {
    %c0_i32 = arith.constant 0 : i32
    %c0_i32_0 = arith.constant 0 : i32
    %c0_i32_1 = arith.constant 0 : i32
    return %arg0, %c0_i32, %c0_i32_0 : i32, i32, i32
  }
}

</mosaic_0001>

<bundles_post_ra>
// kernel: tpu_custom_call.1
= control target key start
LH: loop header
LB: loop body
LE: loop exit
PB: predicated region body
PF: predicated region fallthrough
CT: control target
= control target key end

     0   :  { %7 = vsyncpa [#allocation4], 0  ;;  %s896_s9 = smov 0   ;;  %s1026_s0 = inlined_call_operand.vmem [shape: bf16[2,38,72], index: 0, kind: input, shape index: {}]   ;;  %s1027_s1 = inlined_call_operand.hbm [shape: bf16[3,72,128], index: 1, kind: input, shape index: {}]   ;;  %s1028_s2 = inlined_call_operand.vmem [shape: f32[2,36,128], index: 2, kind: output, shape index: {}]  }
   0x1 LB: > { %s902_s10 = sadd.s32 4294967295, %s874_s9   ;;  %p635_p0 = scmp.ge.s32.totalorder %s874_s9, 1  ;;  %s874_s9 = sphi %s896_s9, %s13_s9  }
   0x2   : > { %p91_p1 = scmp.lt.s32.totalorder %s874_s9, 3  ;;  %s876_s11 = smov [#allocation3]  }
   0x3   : > { %s103_s12 = sshll.u32 %s876_s11, 4  ;;  %p1029_p3 = scmp.eq.s32.totalorder %s902_s10, 0  ;;  %s104_s12 = int_to_ptr.vmem [resolvable:$true] %s103_s12 }
   0x4   : > { %p906_p2 = pnand %p635_p0, %p91_p1  ;;  %s836_s17 = scalar_lea.hbm %s1027_s1, 1728 }
   0x5   : > { %p837_p6 = scmp.ne.s32.totalorder %s1027_s1, %s836_s17  ;;  %p843_p10 = scmp.lt.u32.totalorder %s836_s17, %s1027_s1 }
   0x6   : > { %s1031_s13 = scalar_select %p906_p2, 1, 0 }
   0x7   : > { %p799_p4 = pneg %p906_p2 }
   0x9   : > { %p915_p5 = pnand %p1029_p3, %p799_p4 }
   0xb   : > { %p838_p7 = pneg %p915_p5 }
   0xd   : > { %p839_p8 = pnand %p838_p7, %p837_p6 }
   0xf   : > { %p840_p9 = pneg %p839_p8 }
  0x11   : > { %p845_p11 = pnand %p843_p10, %p840_p9 }
  0x13   : > { %848 = shalt.err (!%p845_p11)
}
  0x14   : > { %s849_s22 = scalar_lea.vmem %s104_s12, 1728  ;;  %p857_p1 = scmp.lt.s32.totalorder %s104_s12, %s104_s12 }
  0x15   : > { %p850_p12 = scmp.ne.s32.totalorder %s104_s12, %s849_s22  ;;  %p858_p4 = scmp.lt.s32.totalorder %s849_s22, %s849_s22 }
  0x17   : > { %p852_p13 = pnand %p850_p12, %p838_p7  ;;  %p859_p3 = por %p858_p4, %p857_p1 }
  0x19   : > { %p853_p0 = pneg %p852_p13 }
  0x1b   : > { %p860_p2 = pnand %p859_p3, %p853_p0 }
  0x1d   : > { %863 = shalt.err (!%p860_p2)
}
  0x1e   : > { %s877_s23 = smov 64   ;;  %s878_s24 = smov 4  }
  0x1f   : > { %802 = dma.hbm_to_vmem [thread:$0]  (!%p915_p5), %s1027_s1, 1728, %s104_s12, [#allocation4], %s877_s23, %s877_s23, %s878_s24  }
  0x20   : > { %p1033_p6 = scmp.ne.s32.totalorder %s1031_s13, 0 }
  0x21   : > { %p1034_p8 = scmp.eq.s32.totalorder (!%p1033_p6), %s902_s10, 0 }
  0x22   : > { %127 = sbr.rel (%p1033_p6) target bundleno = 321 (0x141), region = 28 }
  0x29   : > { %869 = dma.done.wait (%p1034_p8), [#allocation4], 1728   ;;  %p1035_p7 = pmov %p1034_p8 }
  0x2a   : > { %v879_v0 = vmov 0.0   ;;  %vm880_vm0 = vmmov 0   ;;  %p149_p2 = scmp.lt.s32.totalorder %s902_s10, 1  ;;  %v818_v1 = vld [vmem:[#allocation3] sm:$0xff]   ;;  %v820_v3 = vld [vmem:[#allocation3 + $0x8] sm:$0xff]   ;;  %v822_v5 = vld [vmem:[#allocation3 + $0x10] sm:$0xff]  }
  0x2b   : > { %871 = vsyncadd (%p1035_p7), [#allocation4], 4294965568  ;;  %695 = vmatprep.subr.bf16.mxu1 %v879_v0  ;;  %717 = vmatprep.subr.bf16.mxu0 %v879_v0  ;;  %v819_v2 = vld [vmem:[#allocation3 + $0x24] sm:$0xff]   ;;  %v821_v4 = vld [vmem:[#allocation3 + $0x2c] sm:$0xff]   ;;  %vm224_vm1 = vcmask 1043456   ;;  %vm214_vm3 = vcmask 588800  }
  0x2c   : > { %705 = vmatprep.mubr.msk.bf16.mxu1 %vm880_vm0, %v879_v0  ;;  %727 = vmatprep.mubr.msk.bf16.mxu0 %vm880_vm0, %v879_v0  ;;  %s1037_s10 = smov (!%p149_p2, %s902_s10), 1  ;;  %v823_v6 = vld [vmem:[#allocation3 + $0x34] sm:$0xff]   ;;  %v825_v8 = vld [vmem:[#allocation3 + $0x3c] sm:$0xff]   ;;  %v827_v12 = vld [vmem:[#allocation3 + $0x44] ss:$0 sps:$4 sm:$0xff]   ;;  %vm445_vm4 = vcmask 1046528  }
  0x2d   : > { %696 = vmatpush3.bf16.msra.mxu1 %v818_v1  ;;  %718 = vmatpush3.bf16.msra.mxu0 %v819_v2  ;;  %s793_s27 = smul.u32 20, %s1037_s10  ;;  %v824_v7 = vld [vmem:[#allocation3 + $0x18] sm:$0xff]   ;;  %v826_v9 = vld [vmem:[#allocation3 + $0x20] ss:$0 sps:$4 sm:$0xff]   ;;  %v362_v20 = vsel %vm224_vm1, %v827_v12, 0  ;;  %v830_v22 = vld [vmem:[#allocation3 + $0x48] sm:$0xff]  }
  0x2e   : > { %697 = vmatprep.subr.bf16.mxu1 %v879_v0  ;;  %719 = vmatprep.subr.bf16.mxu0 %v879_v0  ;;  %v226_v18 = vsel %vm224_vm1, %v826_v9, 0  ;;  %vm304_vm2 = vsmask.f32 7424  ;;  %v831_v26 = vld [vmem:[#allocation3 + $0x50] sm:$0xff]   ;;  %v833_v29 = vld [vmem:[#allocation3 + $0x58] sm:$0xff]   ;;  %v834_v32 = vld [vmem:[#allocation3 + $0x60] sm:$0xff]  }
  0x2f   : > { %s153_s30 = scalar_lea.vmem %s1026_s0, %s793_s27  ;;  %v835_v33 = vld [vmem:[#allocation3 + $0x68] ss:$0 sps:$4 sm:$0xff]   ;;  %s794_s3 = smul.u32 40, %s1037_s10 }
  0x30   : > { %v959_v10 = vld [vmem:[%s153_s30] sm:$0xff]   ;;  %v962_v11 = vld [vmem:[%s153_s30 + $0x8] sm:$0xff]   ;;  %v968_v17 = vld [vmem:[%s153_s30 + $0x10] ss:$0 sps:$4 sm:$0x77]   ;;  %v488_v35 = vsel %vm224_vm1, %v835_v33, 0 }
  0x31   : > { %698 = vmatpush3.bf16.msra.mxu1 %v820_v3  ;;  %720 = vmatpush3.bf16.msra.mxu0 %v821_v4  ;;  %v305_v13 = vshrl.u32 %v959_v10, 16  ;;  %v307_v14 = vshll.u32 %v959_v10, 16  ;;  %v311_v15 = vshll.u32 %v962_v11, 16  ;;  %v315_v24 = vshrl.u32 %v962_v11, 16  ;;  %s158_s6 = scalar_lea.vmem %s1028_s2, %s794_s3 }
  0x32   : > { %699 = vmatprep.subr.bf16.mxu1 %v879_v0  ;;  %721 = vmatprep.subr.bf16.mxu0 %v879_v0  ;;  %v318_v25 = vshll.u32 %v968_v17, 16  ;;  %v322_v31 = vshrl.u32 %v968_v17, 16  ;;  %v447_v36 = vrot.slane %v962_v11, 1  ;;  %v449_v37 = vrot.slane %v968_v17, 1 }
  0x33   : > { %v309_v16 = vrot.slane %v307_v14, 1  ;;  %v313_v19 = vrot.slane %v311_v15, 1  ;;  %v446_v38 = vrot.slane %v959_v10, 1 }
  0x34   : > { %v320_v28 = vrot.slane %v318_v25, 1  ;;  %v450_v39 = vsel %vm445_vm4, %v447_v36, %v449_v37 }
  0x35   : > { %700 = vmatpush3.bf16.msra.mxu1 %v822_v5  ;;  %722 = vmatpush3.bf16.msra.mxu0 %v823_v6  ;;  %v310_v21 = vor.u32 %v309_v16, %v305_v13  ;;  %v317_v27 = vor.u32 %v315_v24, %v313_v19  ;;  %v448_v40 = vsel %vm445_vm4, %v446_v38, %v447_v36 }
  0x36   : > { %701 = vmatprep.subr.bf16.mxu1 %v879_v0  ;;  %723 = vmatprep.subr.bf16.mxu0 %v879_v0  ;;  %v324_v34 = vor.u32 %v322_v31, %v320_v28 }
  0x37   : > { %v314_v23 = vsel %vm304_vm2, %v310_v21, %v313_v19  ;;  %v321_v30 = vsel %vm304_vm2, %v317_v27, %v320_v28 }
  0x39   : > { %702 = vmatpush3.bf16.msra.mxu1 %v824_v7  ;;  %724 = vmatpush3.bf16.msra.mxu0 %v825_v8 }
  0x3a   : > { %703 = vmatprep.subr.bf16.mxu1 %v879_v0  ;;  %725 = vmatprep.subr.bf16.mxu0 %v879_v0 }
  0x3d   : > { %704 = vmatpush3.bf16.msra.mxu1 %v226_v18  ;;  %726 = vmatpush3.bf16.msra.mxu0 %v362_v20 }
  0x3e   : > { %761 = vmatprep.subr.bf16.mxu1 %v879_v0  ;;  %739 = vmatprep.subr.bf16.mxu0 %v879_v0 }
  0x40   : > { %706 = vmatmul.mubr.msk.bf16.vlgmr.msra.gmra.mrb[0].mxu1 %vm214_vm3, %v959_v10  ;;  %728 = vmatmul.mubr.msk.bf16.vlgmr.msra.gmra.mrb[0].mxu0 %vm214_vm3, %v314_v23 }
  0x41   : > { %766 = vmatpush3.bf16.msra.mxu1 %v830_v22  ;;  %740 = vmatpush3.bf16.msra.mxu0 %v830_v22 }
  0x42   : > { %762 = vmatprep.subr.bf16.mxu1 %v879_v0  ;;  %709 = vmatprep.mubr.msk.bf16.mxu1 %vm880_vm0, %v879_v0 }
  0x43   : > { %731 = vmatprep.mubr.msk.bf16.mxu0 %vm880_vm0, %v879_v0  ;;  %741 = vmatprep.subr.bf16.mxu0 %v879_v0 }
  0x45   : > { %767 = vmatpush3.bf16.msra.mxu1 %v831_v26  ;;  %742 = vmatpush3.bf16.msra.mxu0 %v831_v26 }
  0x46   : > { %763 = vmatprep.subr.bf16.mxu1 %v879_v0  ;;  %743 = vmatprep.subr.bf16.mxu0 %v879_v0 }
  0x48   : > { %710 = vmatmul.mubr.msk.bf16.gmra.mrb[4].mxu1 %vm214_vm3, %v962_v11  ;;  %732 = vmatmul.mubr.msk.bf16.gmra.mrb[4].mxu0 %vm214_vm3, %v321_v30 }
  0x49   : > { %768 = vmatpush3.bf16.msra.mxu1 %v833_v29  ;;  %744 = vmatpush3.bf16.msra.mxu0 %v833_v29 }
  0x4a   : > { %713 = vmatprep.mubr.msk.bf16.mxu1 %vm880_vm0, %v879_v0  ;;  %735 = vmatprep.mubr.msk.bf16.mxu0 %vm880_vm0, %v879_v0 }
  0x4b   : > { %745 = vmatprep.subr.bf16.mxu0 %v879_v0  ;;  %764 = vmatprep.subr.bf16.mxu1 %v879_v0 }
  0x4d   : > { %769 = vmatpush3.bf16.msra.mxu1 %v834_v32  ;;  %746 = vmatpush3.bf16.msra.mxu0 %v834_v32 }
  0x4e   : > { %765 = vmatprep.subr.bf16.mxu1 %v879_v0  ;;  %747 = vmatprep.subr.bf16.mxu0 %v879_v0 }
  0x50   : > { %714 = vmatmul.mubr.msk.bf16.gmra.mrb[8].mxu1 %vm214_vm3, %v968_v17  ;;  %736 = vmatmul.mubr.msk.bf16.gmra.mrb[8].mxu0 %vm214_vm3, %v324_v34 }
  0x51   : > { %770 = vmatpush3.bf16.msra.mxu1 %v488_v35  ;;  %748 = vmatpush3.bf16.msra.mxu0 %v488_v35 }
  0x52   : > { %749 = vmatprep.mubr.msk.bf16.mxu0 %vm880_vm0, %v879_v0  ;;  %753 = vmatprep.mubr.msk.bf16.mxu1 %vm880_vm0, %v879_v0 }
  0x58   : > { %754 = vmatmul.mubr.msk.bf16.vlgmr.msra.gmra.mrb[12].mxu1 %vm214_vm3, %v450_v39  ;;  %750 = vmatmul.mubr.msk.bf16.vlgmr.msra.gmra.mrb[0].mxu0 %vm214_vm3, %v448_v40 }
  0x59   : > { %757 = vmatprep.mubr.msk.bf16.mxu1 %vm880_vm0, %v879_v0 }
  0x60   : > { %758 = vmatmul.mubr.msk.bf16.gmra.mrb[16].mxu1 %vm214_vm3, %v449_v37 }
 0x113   : > { %v262_v41 = vpop.f32.mrb[0].mxu1 }
 0x114   : > { %v707_v42 = vpop.f32.mrb[1].mxu1 }
 0x115   : > { %v265_v43 = vpop.f32.mrb[2].mxu1 }
 0x116   : > { %v708_v44 = vpop.f32.mrb[3].mxu1 }
 0x11b   : > { %v270_v45 = vpop.f32.mrb[4].mxu1  ;;  %v406_v47 = vpop.f32.mrb[4].mxu0 }
 0x11c   : > { %v711_v46 = vpop.f32.mrb[5].mxu1  ;;  %v779_v49 = vadd.f32 %v406_v47, %v270_v45  ;;  %v733_v50 = vpop.f32.mrb[5].mxu0 }
 0x11d   : > { %v273_v48 = vpop.f32.mrb[6].mxu1  ;;  %v409_v52 = vpop.f32.mrb[6].mxu0 }
 0x11e   : > { %v712_v51 = vpop.f32.mrb[7].mxu1  ;;  %v785_v53 = vadd.f32 %v409_v52, %v273_v48  ;;  %v734_v54 = vpop.f32.mrb[7].mxu0 }
 0x123   : > { %v278_v55 = vpop.f32.mrb[8].mxu1  ;;  %v414_v57 = vpop.f32.mrb[8].mxu0 }
 0x124   : > { %288 = vst [vmem:[#allocation2 + $0x20] sm:$0xf] %v278_v55  ;;  %v715_v56 = vpop.f32.mrb[9].mxu1  ;;  %v737_v59 = vpop.f32.mrb[9].mxu0 }
 0x125   : > { %v281_v58 = vpop.f32.mrb[10].mxu1  ;;  %v417_v61 = vpop.f32.mrb[10].mxu0 }
 0x126   : > { %v716_v60 = vpop.f32.mrb[11].mxu1  ;;  %v738_v62 = vpop.f32.mrb[11].mxu0 }
 0x12b   : > { %v293_v63 = vld [vmem:[#allocation2 + $0x20] sm:$0xf]  ;;  %v532_v0 = vpop.f32.mrb[12].mxu1  ;;  %v524_v2 = vpop.f32.mrb[0].mxu0 }
 0x12c   : > { %v424_v1 = vadd.f32 %v414_v57, %v293_v63  ;;  %v782_v3 = vadd.f32 %v779_v49, %v532_v0  ;;  %v755_v4 = vpop.f32.mrb[13].mxu1  ;;  %v773_v5 = vadd.f32 %v524_v2, %v262_v41  ;;  %v751_v6 = vpop.f32.mrb[1].mxu0 }
 0x12d   : > { %v535_v7 = vpop.f32.mrb[14].mxu1  ;;  %v527_v8 = vpop.f32.mrb[2].mxu0 }
 0x12e   : > { %429 = vst [vmem:[#allocation2 + $0x20] sm:$0xf] %v424_v1  ;;  %563 = vst [vmem:[%s158_s6 + $0x10] sm:$0xff] %v782_v3  ;;  %v788_v9 = vadd.f32 %v785_v53, %v535_v7  ;;  %v756_v10 = vpop.f32.mrb[15].mxu1  ;;  %v776_v11 = vadd.f32 %v527_v8, %v265_v43  ;;  %v752_v12 = vpop.f32.mrb[3].mxu0 }
 0x12f   : > { %561 = vst [vmem:[%s158_s6] sm:$0xff] %v773_v5 }
 0x130   : > { %564 = vst [vmem:[%s158_s6 + $0x18] sm:$0xff] %v788_v9  ;;  %562 = vst [vmem:[%s158_s6 + $0x8] sm:$0xff] %v776_v11 }
 0x133   : > { %v540_v13 = vpop.f32.mrb[16].mxu1 }
 0x134   : > { %v759_v14 = vpop.f32.mrb[17].mxu1 }
 0x135   : > { %v434_v15 = vld [vmem:[#allocation2 + $0x20] sm:$0xf]  ;;  %v543_v16 = vpop.f32.mrb[18].mxu1 }
 0x136   : > { %v550_v17 = vadd.f32 %v540_v13, %v434_v15  ;;  %v760_v18 = vpop.f32.mrb[19].mxu1 }
 0x138   : > { %555 = vst [vmem:[#allocation2 + $0x20] sm:$0xf] %v550_v17 }
 0x13f   : > { %v560_v19 = vld [vmem:[#allocation2 + $0x20] sm:$0xf] }
 0x140   : > { %565 = vst [vmem:[%s158_s6 + $0x20] sm:$0xf] %v560_v19 }
 0x141 PF: > { %s13_s9 = sadd.s32 1, %s874_s9  }
 0x142   : > { %p10_p3 = scmp.ge.s32.totalorder %s13_s9, 4  }
 0x144   :  { %12 = sbr.rel (!%p10_p3) target bundleno = 1 (0x1), region = 65 }
 0x14b   :  { %587 = vsyncpa [#allocation4], 1 }
 0x14c   :  { %589 = vsyncpa [#allocation4 + $0x1], 1 }

</bundles_post_ra>
